<compile_context>
chip_gen: v5e
topology: v5e:2x2
jax: 0.10.0
libtpu: 0.0.40
codegen_flags: <defaults>
</compile_context>

<pallas_src>
import math

import jax
import jax.numpy as jnp
from jax.experimental import pallas as pl
from jax.experimental.pallas import tpu as pltpu

LANE = 128      # vreg lane width  (last dim)
SUBLANE = 8     # vreg sublane width (second-to-last dim)


def _round_up(x, m):
    return ((x + m - 1) // m) * m


def _cdiv(a, b):
    return -(-a // b)


# --------------------------------------------------------------------------- #
# Parameter preparation (run ONCE, outside the per-step hot path)
# --------------------------------------------------------------------------- #
def prepare_params(params, use_bf16=False):
    """Pad (and optionally cast) the (W, b) pairs once.

    Layout produced (for M_I=5, M_H=[32,32], M_O=1):
      W1 (8, 128)    b1 (1, 128)
      W2 (128, 128)  b2 (1, 128)
      Wo (128, 1)    bo (1, 1)
    Zero rows / cols / bias lanes keep padded lanes exactly inert
    (tanh(0) = 0), so the math is unchanged.
    """
    n = len(params)
    prepped = []
    for li, (w, b) in enumerate(params):
        w = jnp.asarray(w, jnp.float32)
        b = jnp.asarray(b, jnp.float32).reshape(1, -1)
        fi, fo = w.shape
        is_first = (li == 0)
        is_last = (li == n - 1)
        fi_p = _round_up(fi, SUBLANE) if is_first else _round_up(fi, LANE)
        fo_p = fo if is_last else _round_up(fo, LANE)   # keep output layer narrow
        wp = jnp.zeros((fi_p, fo_p), jnp.float32).at[:fi, :fo].set(w)
        bp = jnp.zeros((1, fo_p), jnp.float32).at[:, :fo].set(b)
        if use_bf16:
            wp = wp.astype(jnp.bfloat16)   # biases stay f32 (added post-matmul)
        prepped.append((wp, bp))
    return prepped


# --------------------------------------------------------------------------- #
# Kernel
# --------------------------------------------------------------------------- #
def _make_mlp_kernel(n_hidden):
    """Full MLP forward for one batch tile.

    refs layout: (x_ref, w1, b1, w2, b2, ..., w_out, b_out, q_ref)
    The Python loop is statically unrolled at trace time, so the whole hot
    path is MXU matmuls + EUP tanh with resident weights.
    """

    def kernel(*refs):
        x_ref = refs[0]
        q_ref = refs[-1]
        params = refs[1:-1]

        h = x_ref[...]                                   # (tile, 8) f32
        for i in range(n_hidden):
            w = params[2 * i][...]
            b = params[2 * i + 1][...]
            # Cast activations to the weight dtype (f32 no-op / bf16 path),
            # accumulate in f32 on the MXU, bias add + tanh in f32.
            h = jnp.tanh(
                jnp.dot(h.astype(w.dtype), w, preferred_element_type=jnp.float32)
                + b)
        w_o = params[2 * n_hidden][...]
        b_o = params[2 * n_hidden + 1][...]
        # Narrow (tile, M_O) store: ~128x less HBM writeback than a lane-padded
        # store; the masked tail store costs nothing extra in the vst slot.
        q_ref[...] = (
            jnp.dot(h.astype(w_o.dtype), w_o, preferred_element_type=jnp.float32)
            + b_o
        ).astype(q_ref.dtype)

    return kernel


def _choose_batch_tile(B, max_tile=16384):
    """Large tiles (cheap in VMEM now that x/Q are narrow), with an even,
    >= 2 step count for bigger batches so v7x's two TensorCores both get
    balanced work and the last tile is not mostly padding."""
    b_pad = _round_up(B, SUBLANE)
    if b_pad <= 2 * SUBLANE:
        return b_pad                                     # tiny batch: single step
    n_steps = max(2, _cdiv(b_pad, max_tile))
    if n_steps % 2:
        n_steps += 1                                     # even split for 2 TCs (v7x)
    return max(SUBLANE, _round_up(_cdiv(b_pad, n_steps), SUBLANE))


# --------------------------------------------------------------------------- #
# Forward wrapper
# --------------------------------------------------------------------------- #
def net_forward(x, prepped_params, *, batch_tile=None):
    """Run the Net forward pass with a Pallas TPU kernel.

    x:              (B, M_I) float32
    prepped_params: output of prepare_params() (padded once, reused per call).
    Returns Q of shape (B, M_O).
    """
    x = jnp.asarray(x, jnp.float32)
    B, M_I = x.shape
    n_hidden = len(prepped_params) - 1

    M_I_p = prepped_params[0][0].shape[0]                # 8
    M_O = prepped_params[-1][0].shape[1]                 # 1 (kept narrow)

    # ---- batch tiling / padding (no divisibility requirement) --------------
    tile = batch_tile if batch_tile is not None else _choose_batch_tile(B)
    tile = max(SUBLANE, _round_up(tile, SUBLANE))
    B_p = _round_up(B, tile)
    if B_p != B or M_I_p != M_I:
        x_p = jnp.zeros((B_p, M_I_p), jnp.float32).at[:B, :M_I].set(x)
    else:
        x_p = x

    flat_params = [a for wb in prepped_params for a in wb]

    # x / Q stream over the batch grid; weights & biases are whole-array VMEM
    # blocks with constant index_maps -> DMA'd once, resident across the loop.
    x_spec = pl.BlockSpec((tile, M_I_p), lambda i: (i, 0))
    q_spec = pl.BlockSpec((tile, M_O), lambda i: (i, 0))
    param_specs = []
    for wp, bp in prepped_params:
        param_specs.append(pl.BlockSpec(wp.shape, lambda i: (0, 0),
                                        memory_space=pltpu.MemorySpace.VMEM))
        param_specs.append(pl.BlockSpec(bp.shape, lambda i: (0, 0),
                                        memory_space=pltpu.MemorySpace.VMEM))

    q_p = pl.pallas_call(
        _make_mlp_kernel(n_hidden),
        out_shape=jax.ShapeDtypeStruct((B_p, M_O), jnp.float32),
        grid=(B_p // tile,),
        in_specs=[x_spec] + param_specs,
        out_specs=q_spec,
        compiler_params=pltpu.CompilerParams(
            dimension_semantics=("parallel",),
        ),
    )(x_p, *flat_params)

    return q_p[:B]                                       # strip batch padding only


# --------------------------------------------------------------------------- #
# Init / reference
# --------------------------------------------------------------------------- #
def init_net_params(key, M_I, M_H, M_O):
    """PyTorch nn.Linear default init: U(-1/sqrt(fan_in), 1/sqrt(fan_in)) for
    both weight and bias. Weights generated directly in (in, out) layout."""
    dims = [M_I] + list(M_H) + [M_O]
    params = []
    for i in range(len(dims) - 1):
        fan_in, fan_out = dims[i], dims[i + 1]
        bound = 1.0 / math.sqrt(fan_in)
        key, kw, kb = jax.random.split(key, 3)
        w = jax.random.uniform(
            kw, (fan_in, fan_out), jnp.float32, minval=-bound, maxval=bound)
        b = jax.random.uniform(
            kb, (1, fan_out), jnp.float32, minval=-bound, maxval=bound)
        params.append((w, b))
    return params


def reference_forward(x, params):
    h = x
    for w, b in params[:-1]:
        h = jnp.tanh(h @ w + b)
    w_o, b_o = params[-1]
    return h @ w_o + b_o


if __name__ == "__main__":
    # Module constants: M_I = 5, M_O = 1; small hidden sizes & batches.
    M_I, M_H, M_O = 5, [32, 32], 1

    key = jax.random.PRNGKey(0)
    params = init_net_params(key, M_I, M_H, M_O)

    # Pad params ONCE (f32, matches torch numerics).
    prepped = prepare_params(params)
    fwd = jax.jit(lambda xx: net_forward(xx, prepped))

    # Case 1: the Net.forward-style small batch.
    key, kx = jax.random.split(key)
    B = 8
    x = jax.random.normal(kx, (B, M_I), dtype=jnp.float32)
    q = jax.block_until_ready(fwd(x))
    q_ref = reference_forward(x, params)
    assert q.shape == (B, M_O)
    assert jnp.allclose(q, q_ref, atol=1e-5, rtol=1e-5), "mismatch vs reference (B=8)"

    # Case 2: ragged batch -> exercises batch padding and a 2-step parallel grid.
    key, kx2 = jax.random.split(key)
    B2 = 50
    x2 = jax.random.normal(kx2, (B2, M_I), dtype=jnp.float32)
    q2 = jax.block_until_ready(fwd(x2))
    q2_ref = reference_forward(x2, params)
    assert q2.shape == (B2, M_O)
    assert jnp.allclose(q2, q2_ref, atol=1e-5, rtol=1e-5), "mismatch vs reference (B=50)"

    # Case 3: optional bf16-matmul path (f32 accumulation); looser tolerance.
    prepped_bf16 = prepare_params(params, use_bf16=True)
    q2_bf16 = jax.block_until_ready(
        jax.jit(lambda xx: net_forward(xx, prepped_bf16))(x2))
    assert q2_bf16.shape == (B2, M_O)
    assert jnp.allclose(q2_bf16, q2_ref, atol=5e-2, rtol=5e-2), \
        "mismatch vs reference (bf16 path)"

    print("KERNEL_OK")
</pallas_src>

<mosaic_0001>
module attributes {stable_mosaic.version = 11 : i64} {
  func.func @kernel(%arg0: i32, %arg1: memref<8x8xf32, #tpu.memory_space<vmem>>, %arg2: memref<8x128xf32, #tpu.memory_space<vmem>>, %arg3: memref<1x128xf32, #tpu.memory_space<vmem>>, %arg4: memref<128x128xf32, #tpu.memory_space<vmem>>, %arg5: memref<1x128xf32, #tpu.memory_space<vmem>>, %arg6: memref<128x1xf32, #tpu.memory_space<vmem>>, %arg7: memref<1x1xf32, #tpu.memory_space<vmem>>, %arg8: memref<8x1xf32, #tpu.memory_space<vmem>>) attributes {dimension_semantics = [#tpu.dimension_semantics<parallel>], iteration_bounds = array<i64: 1>, scalar_prefetch = 0 : i64, scratch_operands = 0 : i64, tpu.core_type = #tpu.core_type<tc>, window_params = [{transform_indices = @transform_0, window_bounds = array<i64: 8, 8>}, {pipeline_mode = #tpu.pipeline_mode<synchronous>, transform_indices = @transform_1, window_bounds = array<i64: 8, 128>}, {pipeline_mode = #tpu.pipeline_mode<synchronous>, transform_indices = @transform_2, window_bounds = array<i64: 1, 128>}, {pipeline_mode = #tpu.pipeline_mode<synchronous>, transform_indices = @transform_3, window_bounds = array<i64: 128, 128>}, {pipeline_mode = #tpu.pipeline_mode<synchronous>, transform_indices = @transform_4, window_bounds = array<i64: 1, 128>}, {pipeline_mode = #tpu.pipeline_mode<synchronous>, transform_indices = @transform_5, window_bounds = array<i64: 128, 1>}, {pipeline_mode = #tpu.pipeline_mode<synchronous>, transform_indices = @transform_6, window_bounds = array<i64: 1, 1>}, {transform_indices = @transform_7, window_bounds = array<i64: 8, 1>}]} {
    %c0 = arith.constant 0 : index
    %c0_0 = arith.constant 0 : index
    %0 = vector.load %arg1[%c0, %c0_0] : memref<8x8xf32, #tpu.memory_space<vmem>>, vector<8x8xf32>
    %c0_1 = arith.constant 0 : index
    %c0_2 = arith.constant 0 : index
    %1 = vector.load %arg2[%c0_1, %c0_2] : memref<8x128xf32, #tpu.memory_space<vmem>>, vector<8x128xf32>
    %c0_3 = arith.constant 0 : index
    %c0_4 = arith.constant 0 : index
    %2 = vector.load %arg3[%c0_3, %c0_4] : memref<1x128xf32, #tpu.memory_space<vmem>>, vector<1x128xf32>
    %cst = arith.constant dense<0.000000e+00> : vector<8x128xf32>
    %3 = tpu.matmul %0, %1, %cst {dimension_numbers = #tpu.dot_dimension_numbers<[1], [0], [0], [1], [0, 0, 1, 1], [], []>} : vector<8x8xf32>, vector<8x128xf32>, vector<8x128xf32> -> vector<8x128xf32>
    %4 = vector.broadcast %2 : vector<1x128xf32> to vector<8x128xf32>
    %5 = arith.addf %3, %4 : vector<8x128xf32>
    %6 = math.tanh %5 : vector<8x128xf32>
    %c0_5 = arith.constant 0 : index
    %c0_6 = arith.constant 0 : index
    %7 = vector.load %arg4[%c0_5, %c0_6] : memref<128x128xf32, #tpu.memory_space<vmem>>, vector<128x128xf32>
    %c0_7 = arith.constant 0 : index
    %c0_8 = arith.constant 0 : index
    %8 = vector.load %arg5[%c0_7, %c0_8] : memref<1x128xf32, #tpu.memory_space<vmem>>, vector<1x128xf32>
    %cst_9 = arith.constant dense<0.000000e+00> : vector<8x128xf32>
    %9 = tpu.matmul %6, %7, %cst_9 {dimension_numbers = #tpu.dot_dimension_numbers<[1], [0], [0], [1], [0, 0, 1, 1], [], []>} : vector<8x128xf32>, vector<128x128xf32>, vector<8x128xf32> -> vector<8x128xf32>
    %10 = vector.broadcast %8 : vector<1x128xf32> to vector<8x128xf32>
    %11 = arith.addf %9, %10 : vector<8x128xf32>
    %12 = math.tanh %11 : vector<8x128xf32>
    %c0_10 = arith.constant 0 : index
    %c0_11 = arith.constant 0 : index
    %13 = vector.load %arg6[%c0_10, %c0_11] : memref<128x1xf32, #tpu.memory_space<vmem>>, vector<128x1xf32>
    %c0_12 = arith.constant 0 : index
    %c0_13 = arith.constant 0 : index
    %14 = vector.load %arg7[%c0_12, %c0_13] : memref<1x1xf32, #tpu.memory_space<vmem>>, vector<1x1xf32>
    %cst_14 = arith.constant dense<0.000000e+00> : vector<8x1xf32>
    %15 = tpu.matmul %12, %13, %cst_14 {dimension_numbers = #tpu.dot_dimension_numbers<[1], [0], [0], [1], [0, 0, 1, 1], [], []>} : vector<8x128xf32>, vector<128x1xf32>, vector<8x1xf32> -> vector<8x1xf32>
    %16 = vector.broadcast %14 : vector<1x1xf32> to vector<8x1xf32>
    %17 = arith.addf %15, %16 : vector<8x1xf32>
    %c0_15 = arith.constant 0 : index
    %c0_16 = arith.constant 0 : index
    %18 = vector.load %arg8[%c0_15, %c0_16] : memref<8x1xf32, #tpu.memory_space<vmem>>, vector<8x1xf32>
    tpu.vector_store %arg8[%c0_15, %c0_16], %17 {strides = array<i32>} : memref<8x1xf32, #tpu.memory_space<vmem>>, vector<8x1xf32>,
    return
  }
  func.func @transform_0(%arg0: i32) -> (i32, i32) {
    %c0_i32 = arith.constant 0 : i32
    %c0_i32_0 = arith.constant 0 : i32
    return %arg0, %c0_i32 : i32, i32
  }
  func.func @transform_1(%arg0: i32) -> (i32, i32) {
    %c0_i32 = arith.constant 0 : i32
    %c0_i32_0 = arith.constant 0 : i32
    %c0_i32_1 = arith.constant 0 : i32
    return %c0_i32, %c0_i32_0 : i32, i32
  }
  func.func @transform_2(%arg0: i32) -> (i32, i32) {
    %c0_i32 = arith.constant 0 : i32
    %c0_i32_0 = arith.constant 0 : i32
    %c0_i32_1 = arith.constant 0 : i32
    return %c0_i32, %c0_i32_0 : i32, i32
  }
  func.func @transform_3(%arg0: i32) -> (i32, i32) {
    %c0_i32 = arith.constant 0 : i32
    %c0_i32_0 = arith.constant 0 : i32
    %c0_i32_1 = arith.constant 0 : i32
    return %c0_i32, %c0_i32_0 : i32, i32
  }
  func.func @transform_4(%arg0: i32) -> (i32, i32) {
    %c0_i32 = arith.constant 0 : i32
    %c0_i32_0 = arith.constant 0 : i32
    %c0_i32_1 = arith.constant 0 : i32
    return %c0_i32, %c0_i32_0 : i32, i32
  }
  func.func @transform_5(%arg0: i32) -> (i32, i32) {
    %c0_i32 = arith.constant 0 : i32
    %c0_i32_0 = arith.constant 0 : i32
    %c0_i32_1 = arith.constant 0 : i32
    return %c0_i32, %c0_i32_0 : i32, i32
  }
  func.func @transform_6(%arg0: i32) -> (i32, i32) {
    %c0_i32 = arith.constant 0 : i32
    %c0_i32_0 = arith.constant 0 : i32
    %c0_i32_1 = arith.constant 0 : i32
    return %c0_i32, %c0_i32_0 : i32, i32
  }
  func.func @transform_7(%arg0: i32) -> (i32, i32) {
    %c0_i32 = arith.constant 0 : i32
    %c0_i32_0 = arith.constant 0 : i32
    return %arg0, %c0_i32 : i32, i32
  }
}

</mosaic_0001>

<bundles_post_ra>
// kernel: _lambda_.1
= control target key start
LH: loop header
LB: loop body
LE: loop exit
PB: predicated region body
PF: predicated region fallthrough
CT: control target
= control target key end

     0   :  { %s312_s0 = inlined_call_operand.vmem [shape: f32[8,8], index: 0, kind: input, shape index: {}]   ;;  %s313_s1 = inlined_call_operand.vmem [shape: f32[8,128], index: 1, kind: input, shape index: {}]   ;;  %s314_s2 = inlined_call_operand.vmem [shape: f32[1,128], index: 2, kind: input, shape index: {}]   ;;  %s315_s3 = inlined_call_operand.hbm [shape: f32[128,128], index: 3, kind: input, shape index: {}]   ;;  %s316_s4 = inlined_call_operand.vmem [shape: f32[1,128], index: 4, kind: input, shape index: {}]   ;;  %s317_s5 = inlined_call_operand.hbm [shape: f32[128,1], index: 5, kind: input, shape index: {}]   ;;  %s318_s6 = inlined_call_operand.<no memory space> [shape: f32[1,1], index: 6, kind: input, shape index: {}]   ;;  %s319_s7 = inlined_call_operand.vmem [shape: f32[8,1], index: 7, kind: output, shape index: {}]  }
   0x1   :  { %v12_v0 = vstv %s318_s6 }
   0x2   :  { %13 = vst [vmem:[#allocation2] sm:$0x1] %v12_v0 }
   0x3   :  { %14 = vsyncpa [#allocation4], 0  ;;  %s26_s28 = sshll.u32 %s315_s3, 4  ;;  %s27_s28 = int_to_ptr.hbm [resolvable:$true] %s26_s28 }
   0x4   :  { %15 = vsyncpa [#allocation6], 0  ;;  %s244_s29 = smov [#allocation3]   ;;  %s41_s10 = sshll.u32 %s317_s5, 4  ;;  %s42_s10 = int_to_ptr.hbm [resolvable:$true] %s41_s10 }
   0x5   :  { %s28_s30 = sshll.u32 %s244_s29, 4  ;;  %s245_s11 = smov 128   ;;  %s29_s30 = int_to_ptr.vmem [resolvable:$true] %s28_s30 }
   0x6   :  { %s246_s12 = smov 8   ;;  %s247_s6 = smov [#allocation5]  }
   0x7   :  { %34 = dma.hbm_to_vmem [thread:$0]  %s27_s28, 2048, %s29_s30, [#allocation4], %s245_s11, %s245_s11, %s246_s12  }
   0x8   :  { %s43_s13 = sshll.u32 %s247_s6, 4  ;;  %s44_s13 = int_to_ptr.vmem [resolvable:$true] %s43_s13 }
   0x9   :  { %49 = dma.hbm_to_vmem [thread:$0]  %s42_s10, 2048, %s44_s13, [#allocation6], %s245_s11, %s245_s11, %s246_s12  }
   0xa   :  { %240 = dma.done.wait [#allocation4], 2048  }
   0xb   :  { %241 = vsyncadd [#allocation4], 4294965248 }
   0xc   :  { %242 = dma.done.wait [#allocation6], 2048  }
   0xd   :  { %243 = vsyncadd [#allocation6], 4294965248  ;;  %vm66_vm0 = vcmask 64512   ;;  %v61_v1 = vld [vmem:[%s313_s1] sm:$0xff]  ;;  %v105_v4 = vld [vmem:[#allocation3 + $0x70] sm:$0xff]  ;;  %vm172_vm1 = vcmask 7168  }
   0xe   :  { %v60_v2 = vld [vmem:[%s312_s0] sm:$0xff]  ;;  %85 = vmatpush.msra.mxu0 %v61_v1  ;;  %v104_v5 = vld [vmem:[#allocation3 + $0x68] sm:$0xff]  ;;  %v101_v8 = vld [vmem:[#allocation3 + $0x50] sm:$0xff] }
   0xf   :  { %v106_v3 = vld [vmem:[#allocation3 + $0x78] sm:$0xff]  ;;  %180 = vmatmul.msk.f32.vlgmr.msra.gmra.mxu0 %vm66_vm0, %v60_v2  ;;  %v103_v6 = vld [vmem:[#allocation3 + $0x60] sm:$0xff]  ;;  %v100_v9 = vld [vmem:[#allocation3 + $0x48] sm:$0xff] }
  0x10   :  { %111 = vmatpush.msra.mxu1 %v106_v3  ;;  %v102_v7 = vld [vmem:[#allocation3 + $0x58] sm:$0xff]  ;;  %v99_v10 = vld [vmem:[#allocation3 + $0x40] sm:$0xff]  ;;  %v97_v12 = vld [vmem:[#allocation3 + $0x30] sm:$0xff] }
  0x11   :  { %v98_v11 = vld [vmem:[#allocation3 + $0x38] sm:$0xff]  ;;  %v96_v13 = vld [vmem:[#allocation3 + $0x28] sm:$0xff]  ;;  %v95_v14 = vld [vmem:[#allocation3 + $0x20] sm:$0xff] }
  0x12   :  { %112 = vmatpush.msra.mxu1 %v105_v4  ;;  %v94_v15 = vld [vmem:[#allocation3 + $0x18] sm:$0xff]  ;;  %v93_v16 = vld [vmem:[#allocation3 + $0x10] sm:$0xff]  ;;  %v92_v17 = vld [vmem:[#allocation3 + $0x8] sm:$0xff] }
  0x13   :  { %v91_v18 = vld [vmem:[#allocation3] sm:$0xff]  ;;  %v147_v19 = vld [vmem:[#allocation5 + $0x78] sm:$0xff]  ;;  %v146_v20 = vld [vmem:[#allocation5 + $0x70] sm:$0xff] }
  0x14   :  { %113 = vmatpush.msra.mxu1 %v104_v5  ;;  %152 = vmatpush.msra.mxu2 %v147_v19  ;;  %v145_v21 = vld [vmem:[#allocation5 + $0x68] sm:$0xff]  ;;  %v144_v22 = vld [vmem:[#allocation5 + $0x60] sm:$0xff]  ;;  %v143_v23 = vld [vmem:[#allocation5 + $0x58] sm:$0xff] }
  0x15   :  { %v142_v24 = vld [vmem:[#allocation5 + $0x50] sm:$0xff]  ;;  %v141_v25 = vld [vmem:[#allocation5 + $0x48] sm:$0xff]  ;;  %v140_v26 = vld [vmem:[#allocation5 + $0x40] sm:$0xff] }
  0x16   :  { %114 = vmatpush.msra.mxu1 %v103_v6  ;;  %153 = vmatpush.msra.mxu2 %v146_v20  ;;  %v139_v27 = vld [vmem:[#allocation5 + $0x38] sm:$0xff]  ;;  %v138_v28 = vld [vmem:[#allocation5 + $0x30] sm:$0xff]  ;;  %v137_v29 = vld [vmem:[#allocation5 + $0x28] sm:$0xff] }
  0x17   :  { %v185_v30 = vld [vmem:[%s314_s2] ss:$0 sm:$0xff]  ;;  %v136_v34 = vld [vmem:[#allocation5 + $0x20] sm:$0xff]  ;;  %v134_v36 = vld [vmem:[#allocation5 + $0x10] sm:$0xff] }
  0x18   :  { %115 = vmatpush.msra.mxu1 %v102_v7  ;;  %154 = vmatpush.msra.mxu2 %v145_v21  ;;  %v135_v35 = vld [vmem:[#allocation5 + $0x18] sm:$0xff]  ;;  %v133_v37 = vld [vmem:[#allocation5 + $0x8] sm:$0xff]  ;;  %v132_v38 = vld [vmem:[#allocation5] sm:$0xff] }
  0x19   :  { %v186_v39 = vld [vmem:[%s316_s4] ss:$0 sm:$0xff] }
  0x1a   :  { %116 = vmatpush.msra.mxu1 %v101_v8  ;;  %155 = vmatpush.msra.mxu2 %v144_v22  ;;  %v187_v43 = vld [vmem:[#allocation2] ss:$0 sm:$0xff] }
  0x1c   :  { %117 = vmatpush.msra.mxu1 %v100_v9  ;;  %156 = vmatpush.msra.mxu2 %v143_v23 }
  0x1e   :  { %118 = vmatpush.msra.mxu1 %v99_v10  ;;  %157 = vmatpush.msra.mxu2 %v142_v24 }
  0x20   :  { %119 = vmatpush.msra.mxu1 %v98_v11  ;;  %158 = vmatpush.msra.mxu2 %v141_v25 }
  0x22   :  { %120 = vmatpush.msra.mxu1 %v97_v12  ;;  %159 = vmatpush.msra.mxu2 %v140_v26 }
  0x24   :  { %121 = vmatpush.msra.mxu1 %v96_v13  ;;  %160 = vmatpush.msra.mxu2 %v139_v27 }
  0x26   :  { %122 = vmatpush.msra.mxu1 %v95_v14  ;;  %161 = vmatpush.msra.mxu2 %v138_v28 }
  0x28   :  { %123 = vmatpush.msra.mxu1 %v94_v15  ;;  %162 = vmatpush.msra.mxu2 %v137_v29 }
  0x2a   :  { %124 = vmatpush.msra.mxu1 %v93_v16  ;;  %163 = vmatpush.msra.mxu2 %v136_v34 }
  0x2c   :  { %125 = vmatpush.msra.mxu1 %v92_v17  ;;  %164 = vmatpush.msra.mxu2 %v135_v35 }
  0x2e   :  { %126 = vmatpush.msra.mxu1 %v91_v18  ;;  %165 = vmatpush.msra.mxu2 %v134_v36 }
  0x30   :  { %166 = vmatpush.msra.mxu2 %v133_v37 }
  0x32   :  { %167 = vmatpush.msra.mxu2 %v132_v38 }
  0x8c   :  { %v87_v31 = vpop.f32.mrf.mxu0 }
  0x8d   :  { %v88_v32 = vadd.f32 %v185_v30, %v87_v31 }
  0x8f   :  { %188 = vtanh.f32 %v88_v32 }
  0x95   :  { %v189_v33 = vpop.eup %188 }
  0x96   :  { %127 = vmatmul.f32.vlgmr.msra.gmra.mxu1 %v189_v33 }
 0x113   :  { %v128_v40 = vpop.f32.mrf.mxu1 }
 0x114   :  { %v129_v41 = vadd.f32 %v186_v39, %v128_v40 }
 0x116   :  { %190 = vtanh.f32 %v129_v41 }
 0x11c   :  { %v191_v42 = vpop.eup %190 }
 0x11d   :  { %168 = vmatmul.f32.vlgmr.msra.gmra.mxu2 %v191_v42 }
 0x1a0   :  { %v169_v44 = vpop.f32.mrf.mxu2 }
 0x1a1   :  { %v170_v45 = vadd.f32 %v187_v43, %v169_v44 }
 0x1a3   :  { %173 = vst.msk [vmem:[%s319_s7] sm:$0xff] %vm172_vm1, %v170_v45 }
 0x1a4   :  { %178 = vsyncpa [#allocation4], 1 }
 0x1a5   :  { %179 = vsyncpa [#allocation6], 1 }

</bundles_post_ra>
